<compile_context>
chip_gen: v5e
topology: v5e:2x2
jax: 0.10.0
libtpu: 0.0.40
codegen_flags: <defaults>
</compile_context>

<pallas_src>
import jax
import jax.numpy as jnp
from jax.experimental import pallas as pl
from jax.experimental.pallas import tpu as pltpu


def _round_up(n, m):
    return ((n + m - 1) // m) * m


def _choose_tile_n(n, tn_max):
    """Lane-dense tile along the edge axis.

    Large (default up to 16384 lanes = 2 MiB f32 per x tile) to amortize the
    per-grid-step overhead, but capped so the grid has at least 2 steps when N
    is large enough for both v7x TensorCores to get work.  For small N we use
    the full extent as a single block (block == array dim is always legal).
    """
    target = max(128, _round_up(pl.cdiv(n, 2), 128))
    tn_eff = min(tn_max, target)
    if tn_eff >= n:
        return n
    return tn_eff


def _edge_cost_kernel(w_ref, b_ref, xT_ref, o_ref):
    # w_ref:  (K, O)   VMEM, resident (constant index map)
    # b_ref:  (O,)     SMEM scalars
    # xT_ref: (K, tn)  VMEM, lane-dense along the edge axis
    # o_ref:  (O, tn)  VMEM, lane-dense output tile
    for o in range(o_ref.shape[0]):            # output_size is tiny (typically 1)
        # Re-read the x tile per output column (the vld slot has slack) instead
        # of keeping a (K, tn) f32 value live across the unrolled loop.
        x = xT_ref[...].astype(jnp.float32)
        w_col = w_ref[:, o:o + 1].astype(jnp.float32)                 # (K, 1)
        z = jnp.sum(w_col * x, axis=0, keepdims=True) + b_ref[o]      # (1, tn)
        # sigmoid(z) = 1 / (1 + exp(-z)); exp on the EUP, exact reciprocal.
        # (approx=True is available for extra headroom once O grows.)
        y = pl.reciprocal(1.0 + jnp.exp(-z), approx=False)
        o_ref[o:o + 1, :] = y.astype(o_ref.dtype)


def edge_cost_predictor_feature_major(xT, weight, bias, *, tn=16384,
                                      out_dtype=jnp.float32):
    """Core entry point. xT: [K, N] (feature-major, f32 or bf16);
    weight: [K, O]; bias: [O].  Returns sigmoid(x @ W + b) with shape [N, O].
    """
    K, N = xT.shape
    K2, O = weight.shape
    assert K == K2
    assert bias.shape == (O,)
    bias = bias.astype(jnp.float32)

    tn_eff = _choose_tile_n(N, tn)
    grid = (pl.cdiv(N, tn_eff),)

    out_t = pl.pallas_call(
        _edge_cost_kernel,
        out_shape=jax.ShapeDtypeStruct((O, N), out_dtype),
        grid_spec=pltpu.PrefetchScalarGridSpec(
            num_scalar_prefetch=0,
            grid=grid,
            in_specs=[
                pl.BlockSpec((K, O), lambda i: (0, 0)),               # weight, VMEM-resident
                pl.BlockSpec(memory_space=pltpu.MemorySpace.SMEM),    # bias scalars
                pl.BlockSpec((K, tn_eff), lambda i: (0, i)),          # lane-dense x tile
            ],
            out_specs=pl.BlockSpec((O, tn_eff), lambda i: (0, i)),
        ),
        compiler_params=pltpu.CompilerParams(
            dimension_semantics=("parallel",),     # v7x: shard grid over 2 TCs
            vmem_limit_bytes=32 * 1024 * 1024,     # headroom over v5e's 16 MiB default
        ),
    )(weight, bias, xT)

    # (O, N) -> (N, O); for O == 1 this is a free reshape.
    return out_t.T


def edge_cost_predictor(x, weight, bias, *, tn=16384, out_dtype=jnp.float32):
    """Module-native layout: x: [N, K].  Prefer the feature-major entry point
    upstream -- the x.T here is one extra HBM pass over x that the kernel
    itself does not need."""
    return edge_cost_predictor_feature_major(x.T, weight, bias, tn=tn,
                                             out_dtype=out_dtype)


if __name__ == "__main__":
    key = jax.random.PRNGKey(0)

    def ref_forward(x, w, b):
        return jax.nn.sigmoid(x @ w + b[None, :])

    # Two small cases consistent with the module:
    #  - N=16 edges, 32 features, 1 output (typical use; single full block)
    #  - N=300 edges, 32 features, 3 outputs (multi-block grid + partial last
    #    block + per-row output stores)
    for (N, input_size, output_size) in [(16, 32, 1), (300, 32, 3)]:
        kx, kw, kb, key = jax.random.split(key, 4)
        # nn.Linear-style init: U(-1/sqrt(in), 1/sqrt(in)).
        bound = 1.0 / jnp.sqrt(jnp.float32(input_size))
        weight = jax.random.uniform(
            kw, (input_size, output_size), jnp.float32, minval=-bound, maxval=bound)
        bias = jax.random.uniform(
            kb, (output_size,), jnp.float32, minval=-bound, maxval=bound)
        x = jax.random.normal(kx, (N, input_size), jnp.float32)

        out = jax.block_until_ready(edge_cost_predictor(x, weight, bias))
        ref = ref_forward(x, weight, bias)
        assert out.shape == (N, output_size)
        assert jnp.allclose(out, ref, atol=1e-5, rtol=1e-5)

        # Feature-major path (no wrapper transpose) produces the same result.
        out_fm = jax.block_until_ready(
            edge_cost_predictor_feature_major(x.T, weight, bias))
        assert jnp.allclose(out_fm, ref, atol=1e-5, rtol=1e-5)

    print("KERNEL_OK")
</pallas_src>

<mosaic_0001>
module attributes {stable_mosaic.version = 11 : i64} {
  func.func @_edge_cost_kernel(%arg0: i32, %arg1: memref<32x1xf32, #tpu.memory_space<vmem>>, %arg2: memref<1xf32, #tpu.memory_space<smem>>, %arg3: memref<32x16xf32, #tpu.memory_space<vmem>>, %arg4: memref<1x16xf32, #tpu.memory_space<vmem>>) attributes {dimension_semantics = [#tpu.dimension_semantics<parallel>], iteration_bounds = array<i64: 1>, scalar_prefetch = 0 : i64, scratch_operands = 0 : i64, tpu.core_type = #tpu.core_type<tc>, window_params = [{pipeline_mode = #tpu.pipeline_mode<synchronous>, transform_indices = @transform_0, window_bounds = array<i64: 32, 1>}, {transform_indices = @transform_1, window_bounds = array<i64: 1>}, {transform_indices = @transform_2, window_bounds = array<i64: 32, 16>}, {transform_indices = @transform_3, window_bounds = array<i64: 1, 16>}]} {
    %c0 = arith.constant 0 : index
    %c0_0 = arith.constant 0 : index
    %0 = vector.load %arg3[%c0, %c0_0] : memref<32x16xf32, #tpu.memory_space<vmem>>, vector<32x16xf32>
    %c0_1 = arith.constant 0 : index
    %c0_2 = arith.constant 0 : index
    %1 = vector.load %arg1[%c0_1, %c0_2] : memref<32x1xf32, #tpu.memory_space<vmem>>, vector<32x1xf32>
    %2 = vector.broadcast %1 : vector<32x1xf32> to vector<32x16xf32>
    %3 = arith.mulf %2, %0 : vector<32x16xf32>
    %cst = arith.constant dense<0.000000e+00> : vector<16xf32>
    %4 = vector.multi_reduction <add>, %3, %cst [0] : vector<32x16xf32> to vector<16xf32>
    %5 = vector.shape_cast %4 : vector<16xf32> to vector<1x16xf32>
    %c0_3 = arith.constant 0 : index
    %6 = memref.load %arg2[%c0_3] : memref<1xf32, #tpu.memory_space<smem>>
    %7 = vector.broadcast %6 : f32 to vector<1x16xf32>
    %8 = arith.addf %5, %7 : vector<1x16xf32>
    %cst_4 = arith.constant 0.000000e+00 : f32
    %9 = vector.broadcast %cst_4 : f32 to vector<1x16xf32>
    %10 = arith.subf %9, %8 : vector<1x16xf32>
    %11 = math.exp %10 : vector<1x16xf32>
    %cst_5 = arith.constant 1.000000e+00 : f32
    %12 = vector.broadcast %cst_5 : f32 to vector<1x16xf32>
    %13 = arith.addf %12, %11 : vector<1x16xf32>
    %14 = tpu.reciprocal %13 : vector<1x16xf32> -> vector<1x16xf32>
    %c0_6 = arith.constant 0 : index
    %c0_7 = arith.constant 0 : index
    %15 = vector.load %arg4[%c0_6, %c0_7] : memref<1x16xf32, #tpu.memory_space<vmem>>, vector<1x16xf32>
    tpu.vector_store %arg4[%c0_6, %c0_7], %14 {strides = array<i32>} : memref<1x16xf32, #tpu.memory_space<vmem>>, vector<1x16xf32>,
    return
  }
  func.func @transform_0(%arg0: i32) -> (i32, i32) {
    %c0_i32 = arith.constant 0 : i32
    %c0_i32_0 = arith.constant 0 : i32
    %c0_i32_1 = arith.constant 0 : i32
    return %c0_i32, %c0_i32_0 : i32, i32
  }
  func.func @transform_1(%arg0: i32) -> i32 {
    %c0_i32 = arith.constant 0 : i32
    %c0_i32_0 = arith.constant 0 : i32
    return %c0_i32 : i32
  }
  func.func @transform_2(%arg0: i32) -> (i32, i32) {
    %c0_i32 = arith.constant 0 : i32
    %c0_i32_0 = arith.constant 0 : i32
    return %c0_i32, %arg0 : i32, i32
  }
  func.func @transform_3(%arg0: i32) -> (i32, i32) {
    %c0_i32 = arith.constant 0 : i32
    %c0_i32_0 = arith.constant 0 : i32
    return %c0_i32, %arg0 : i32, i32
  }
}

</mosaic_0001>

<bundles_post_ra>
// kernel: tpu_custom_call.1
= control target key start
LH: loop header
LB: loop body
LE: loop exit
PB: predicated region body
PF: predicated region fallthrough
CT: control target
= control target key end

     0   :  { %v135_v2 = vmov 0   ;;  %s187_s0 = inlined_call_operand.vmem [shape: f32[32,1], index: 0, kind: input, shape index: {}]   ;;  %s188_s1 = inlined_call_operand.<no memory space> [shape: f32[1], index: 1, kind: input, shape index: {}]   ;;  %s189_s2 = inlined_call_operand.vmem [shape: f32[32,16], index: 2, kind: input, shape index: {}]   ;;  %s190_s3 = inlined_call_operand.hbm [shape: f32[1,16], index: 3, kind: output, shape index: {}]  }
   0x1   :  { %v22_v0 = vld [vmem:[%s187_s0 + $0x10] sm:$0xff]  ;;  %v20_v1 = vld [vmem:[%s187_s0] sm:$0xff]  ;;  %104 = vset.pattern.permute.xlu1 %v135_v2  ;;  %103 = vset.pattern.permute.xlu0 %v135_v2 }
   0x2   :  { %9 = vsyncpa [#allocation4], 0  ;;  %36 = vperm.xlu1 %104, %v22_v0   ;;  %26 = vperm.xlu0 %103, %v20_v1   ;;  %v23_v3 = vld [vmem:[%s187_s0 + $0x18] sm:$0xff]  ;;  %v21_v4 = vld [vmem:[%s187_s0 + $0x8] sm:$0xff]  ;;  %vm48_vm0 = vcmask 130048   ;;  %v63_v29 = vstv %s188_s1  ;;  %s92_s1 = sshll.u32 %s190_s3, 4  ;;  %s93_s1 = int_to_ptr.hbm [resolvable:$true] %s92_s1 }
   0x3   :  { %v16_v7 = vld [vmem:[%s189_s2] sm:$0xff]  ;;  %v18_v8 = vld [vmem:[%s189_s2 + $0x10] sm:$0xff]  ;;  %v17_v9 = vld [vmem:[%s189_s2 + $0x8] sm:$0xff]  ;;  %vm83_vm4 = vcmask 122880  }
   0x4   :  { %v19_v12 = vld [vmem:[%s189_s2 + $0x18] sm:$0xff]  ;;  %s136_s2 = smov [#allocation3]  }
   0x5   :  { %s90_s29 = sshll.u32 %s136_s2, 4  ;;  %s91_s29 = int_to_ptr.vmem [resolvable:$true] %s90_s29 }
   0xa   :  { %41 = vperm.xlu1 %104, %v23_v3   ;;  %31 = vperm.xlu0 %103, %v21_v4  }
  0x74   :  { %v37_v5 = vpop.permute.xlu1 %36  ;;  %v27_v6 = vpop.permute.xlu0 %26 }
  0x75   :  { %v44_v10 = vmul.f32 %v27_v6, %v16_v7  ;;  %v46_v14 = vmul.f32 %v37_v5, %v18_v8 }
  0x77   :  { %v49_v16 = vsel %vm48_vm0, %v44_v10, 0.0  ;;  %v52_v20 = vsel %vm48_vm0, %v46_v14, 0.0 }
  0x7c   :  { %v42_v11 = vpop.permute.xlu1 %41  ;;  %v32_v13 = vpop.permute.xlu0 %31 }
  0x7d   :  { %v45_v15 = vmul.f32 %v32_v13, %v17_v9  ;;  %v47_v17 = vmul.f32 %v42_v11, %v19_v12 }
  0x7f   :  { %v50_v18 = vsel %vm48_vm0, %v45_v15, 0.0  ;;  %v54_v22 = vsel %vm48_vm0, %v47_v17, 0.0 }
  0x80   :  { %v51_v19 = vadd.f32 %v50_v18, %v49_v16 }
  0x82   :  { %v53_v21 = vadd.f32 %v52_v20, %v51_v19 }
  0x84   :  { %v55_v23 = vadd.f32 %v54_v22, %v53_v21 }
  0x86   :  { %v56_v24 = vrot.slane %v55_v23, 4 }
  0x88   :  { %v57_v25 = vadd.f32 %v56_v24, %v55_v23 }
  0x8a   :  { %v58_v26 = vrot.slane %v57_v25, 2 }
  0x8c   :  { %v59_v27 = vadd.f32 %v58_v26, %v57_v25 }
  0x8e   :  { %v60_v28 = vrot.slane %v59_v27, 1 }
  0x90   :  { %v61_v30 = vadd.f32 %v60_v28, %v59_v27 }
  0x92   :  { %v64_v31 = vadd.f32 %v63_v29, %v61_v30 }
  0x94   :  { %v65_v32 = vsub.f32 0.0, %v64_v31 }
  0x96   :  { %v66_v33 = vmul.f32 1.442695, %v65_v32 }
  0x98   :  { %105 = vpow2.f32 %v66_v33 }
  0x9e   :  { %v106_v34 = vpop.eup %105 }
  0x9f   :  { %v68_v35 = vadd.f32 1.0, %v106_v34 }
  0xa1   :  { %107 = vrcp.f32 %v68_v35  ;;  %v80_v39 = vand.u32 2147483648, %v68_v35  ;;  %v78_v41 = vand.u32 2147483647, %v68_v35  ;;  %vm74_vm2 = vweird.f32 %v68_v35 }
  0xa3   :  { %v81_v43 = vor.u32 1.1754944e-38, %v80_v39  ;;  %vm79_vm5 = vcmp.eq.f32.partialorder %v78_v41, 8.507059e+37 }
  0xa7   :  { %v108_v36 = vpop.eup %107 }
  0xa8   :  { %v70_v37 = vmul.f32 %v108_v36, %v68_v35  ;;  %vm75_vm1 = vweird.f32 %v108_v36 }
  0xa9   :  { %vm76_vm3 = vmor %vm74_vm2, %vm75_vm1 }
  0xaa   :  { %v71_v38 = vsub.f32 1.0, %v70_v37 }
  0xac   :  { %v72_v40 = vmul.f32 %v108_v36, %v71_v38 }
  0xae   :  { %v73_v42 = vadd.f32 %v108_v36, %v72_v40 }
  0xb0   :  { %v77_v44 = vsel %vm76_vm3, %v108_v36, %v73_v42 }
  0xb1   :  { %v82_v45 = vsel %vm79_vm5, %v81_v43, %v77_v44 }
  0xb2   :  { %84 = vst.msk [vmem:[#allocation3] sm:$0x1] %vm83_vm4, %v82_v45 }
  0xb3   :  { %95 = dma.vmem_to_hbm [thread:$0]  %s91_s29, 16, %s93_s1, [#allocation4]  }
  0xb4   :  { %133 = dma.done.wait [#allocation4], 16  }
  0xb5   :  { %134 = vsyncadd [#allocation4], 4294967280 }
  0xb6   :  { %100 = vsyncpa [#allocation4], 1 }

</bundles_post_ra>
